<compile_context>
chip_gen: v5e
topology: v5e:2x2
jax: 0.10.0
libtpu: 0.0.40
codegen_flags: <defaults>
</compile_context>

<pallas_src>
import functools

import jax
import jax.numpy as jnp
from jax.experimental import pallas as pl
from jax.experimental.pallas import tpu as pltpu

LANE = 128
SUBLANE = 8


def _round_up(x, m):
    return ((x + m - 1) // m) * m


def _pad2(x, rows, cols):
    pr = rows - x.shape[0]
    pc = cols - x.shape[1]
    if pr == 0 and pc == 0:
        return x  # no XLA pad op (and no extra HBM traffic) when already aligned
    return jnp.pad(x, ((0, pr), (0, pc)))


def autofusion_kernel(z_ref, w1_ref, b1_ref, w2_ref, b2_ref,
                      w3_ref, b3_ref, w4_ref, b4_ref,
                      comp_ref, loss_ref,
                      *, true_batch, block_rows, mask_rows):
    step = pl.program_id(0)

    z = z_ref[...].astype(jnp.float32)          # (TB, Fp), lane-dense
    cdt = w1_ref.dtype                          # MXU-input dtype (f32 or bf16)

    # fuse_in: Linear -> Tanh -> Linear -> ReLU
    h1 = jnp.tanh(
        jnp.dot(z.astype(cdt), w1_ref[...], preferred_element_type=jnp.float32)
        + b1_ref[...]
    )
    comp = jnp.maximum(
        jnp.dot(h1.astype(cdt), w2_ref[...], preferred_element_type=jnp.float32)
        + b2_ref[...],
        0.0,
    )

    # fuse_out: Linear -> ReLU -> Linear
    h2 = jnp.maximum(
        jnp.dot(comp.astype(cdt), w3_ref[...], preferred_element_type=jnp.float32)
        + b3_ref[...],
        0.0,
    )
    recon = (
        jnp.dot(h2.astype(cdt), w4_ref[...], preferred_element_type=jnp.float32)
        + b4_ref[...]
    )

    # Lane-dense (TB, Lp) unmasked store of the compressed code.
    comp_ref[...] = comp.astype(comp_ref.dtype)

    # Per-tile MSE partial sum (f32).  Padded feature columns are exactly zero by
    # construction; padded batch rows (only present on a ragged last tile) are
    # masked out.  No cross-step accumulation -> batch grid axis can be "parallel".
    diff = recon - z
    sq = diff * diff
    if mask_rows:  # static Python bool: only emitted when Bp > true batch
        row = step * block_rows + jax.lax.broadcasted_iota(jnp.int32, sq.shape, 0)
        sq = jnp.where(row < true_batch, sq, 0.0)
    loss_ref[...] = jnp.sum(jnp.sum(sq, axis=1, keepdims=True), axis=0, keepdims=True)


def autofusion_forward(z, params, *, block_rows=512, param_dtype=jnp.float32,
                       single_buffer_weights=True):
    """Fused AutoFusion forward pass. Returns {'z': compressed_z, 'loss': scalar}."""
    w1, b1, w2, b2, w3, b3, w4, b4 = params
    B, F = z.shape
    H = w1.shape[1]
    L = w2.shape[1]

    # Lane-dense padded dims (multiples of 128) and sublane-aligned batch tile.
    Fp = _round_up(F, LANE)
    Hp = _round_up(H, LANE)
    Lp = _round_up(L, LANE)
    tb = _round_up(min(block_rows, _round_up(B, SUBLANE)), SUBLANE)
    Bp = _round_up(B, tb)
    num_tiles = Bp // tb

    # Zero-pad operands to the lane-dense layout (exact; see header comment).
    # _pad2 is a no-op (no extra XLA op) when the shape is already aligned.
    zp = _pad2(z.astype(jnp.float32), Bp, Fp)
    w1p = _pad2(w1, Fp, Hp).astype(param_dtype)
    w2p = _pad2(w2, Hp, Lp).astype(param_dtype)
    w3p = _pad2(w3, Lp, Hp).astype(param_dtype)
    w4p = _pad2(w4, Hp, Fp).astype(param_dtype)
    b1p = _pad2(b1.astype(jnp.float32), 1, Hp)
    b2p = _pad2(b2.astype(jnp.float32), 1, Lp)
    b3p = _pad2(b3.astype(jnp.float32), 1, Hp)
    b4p = _pad2(b4.astype(jnp.float32), 1, Fp)

    kernel = functools.partial(
        autofusion_kernel,
        true_batch=B,
        block_rows=tb,
        mask_rows=(Bp != B),
    )

    const = lambda i: (0, 0)  # weights / biases stay VMEM-resident over the grid
    if single_buffer_weights:
        # Constant-index operands are DMA'd exactly once; a second pipeline buffer
        # would be pure VMEM waste (decisive on v7x's 64 MiB per-TC budget).
        wspec = lambda shp: pl.BlockSpec(shp, const, pipeline_mode=pl.Buffered(1))
    else:
        wspec = lambda shp: pl.BlockSpec(shp, const)

    in_specs = [
        pl.BlockSpec((tb, Fp), lambda i: (i, 0)),       # z tile (streamed)
        wspec((Fp, Hp)), wspec((1, Hp)),
        wspec((Hp, Lp)), wspec((1, Lp)),
        wspec((Lp, Hp)), wspec((1, Hp)),
        wspec((Hp, Fp)), wspec((1, Fp)),
    ]
    out_specs = (
        pl.BlockSpec((tb, Lp), lambda i: (i, 0)),       # compressed_z (lane-dense)
        pl.BlockSpec((1, 1), lambda i: (i, 0)),         # per-tile loss partial
    )

    itemsize = jnp.dtype(param_dtype).itemsize
    weight_bytes = itemsize * (Fp * Hp + Hp * Lp + Lp * Hp + Hp * Fp)
    bias_bytes = 4 * (2 * Hp + Lp + Fp)
    stream_bytes = 4 * (Bp * Fp + Bp * Lp)
    flops = 2 * Bp * (Fp * Hp + Hp * Lp + Lp * Hp + Hp * Fp)

    # Generation-aware scoped-VMEM limit: what we actually need, capped at the
    # physical per-core capacity minus 16 MiB headroom for compiler scratch.
    w_bufs = 1 if single_buffer_weights else 2
    needed = (w_bufs * (weight_bytes + bias_bytes)
              + 2 * 4 * tb * (Fp + Lp)        # double-buffered z in / comp out
              + (4 << 20))                    # margin for internal scratch
    try:
        cap = pltpu.get_tpu_info().vmem_capacity_bytes
    except Exception:
        cap = 64 << 20                        # conservative fallback (v7x per-TC)
    safe_cap = max(16 << 20, cap - (16 << 20))
    vmem_limit = int(min(safe_cap, max(needed, 32 << 20)))

    comp, loss_parts = pl.pallas_call(
        kernel,
        grid=(num_tiles,),
        in_specs=in_specs,
        out_specs=out_specs,
        out_shape=(
            jax.ShapeDtypeStruct((Bp, Lp), jnp.float32),
            jax.ShapeDtypeStruct((num_tiles, 1), jnp.float32),
        ),
        compiler_params=pltpu.CompilerParams(
            # No cross-step reduction anymore -> parallel (megacore on v7x).
            dimension_semantics=("parallel",),
            vmem_limit_bytes=vmem_limit,
        ),
        cost_estimate=pl.CostEstimate(
            flops=int(flops),
            transcendentals=int(Bp * Hp),
            bytes_accessed=int(weight_bytes + bias_bytes + stream_bytes
                               + 4 * num_tiles),
        ),
    )(zp, w1p, b1p, w2p, b2p, w3p, b3p, w4p, b4p)

    # Finalize the MSE in the wrapper: O(num_tiles) scalars, negligible.
    loss = jnp.sum(loss_parts) * (1.0 / float(B * F))
    comp = comp if (B == Bp and L == Lp) else comp[:B, :L]
    return {"z": comp, "loss": loss}


def init_params(key, input_features, latent_dim):
    """Deterministic synthetic parameter init (PyTorch-Linear-like uniform scaling)."""
    f = input_features
    h = input_features // 2
    sizes = [
        (f, h), (1, h),                    # fuse_in Linear 1
        (h, latent_dim), (1, latent_dim),  # fuse_in Linear 2
        (latent_dim, h), (1, h),           # fuse_out Linear 1
        (h, f), (1, f),                    # fuse_out Linear 2
    ]
    params = []
    for i, shape in enumerate(sizes):
        key, sub = jax.random.split(key)
        fan_in = shape[0] if shape[0] > 1 else sizes[i - 1][0]
        bound = 1.0 / jnp.sqrt(jnp.float32(fan_in))
        params.append(
            jax.random.uniform(sub, shape, jnp.float32, minval=-bound, maxval=bound)
        )
    return tuple(params)


def reference_forward(z, params):
    """Pure-JAX reference for correctness checking."""
    w1, b1, w2, b2, w3, b3, w4, b4 = params
    h1 = jnp.tanh(z @ w1 + b1)
    comp = jnp.maximum(h1 @ w2 + b2, 0.0)
    h2 = jnp.maximum(comp @ w3 + b3, 0.0)
    recon = h2 @ w4 + b4
    loss = jnp.mean((recon - z) ** 2)
    return comp, loss


if __name__ == "__main__":
    # Small shapes consistent with the module: batch=8, input_features=32, latent_dim=16
    batch = 8
    input_features = 32
    latent_dim = 16

    key = jax.random.PRNGKey(0)
    key, zkey = jax.random.split(key)
    z = jax.random.normal(zkey, (batch, input_features), dtype=jnp.float32)

    params = init_params(key, input_features, latent_dim)

    try:
        out = jax.jit(autofusion_forward)(z, params)
        jax.block_until_ready(out)
    except Exception:
        # Fallback in case this jax build rejects single-buffered (Buffered(1))
        # constant inputs: identical math, default double-buffering.
        out = jax.jit(
            functools.partial(autofusion_forward, single_buffer_weights=False)
        )(z, params)
        jax.block_until_ready(out)

    comp_ref, loss_ref_val = reference_forward(z, params)
    assert jnp.allclose(out["z"], comp_ref, atol=1e-5, rtol=1e-5)
    assert jnp.allclose(out["loss"], loss_ref_val, atol=1e-5, rtol=1e-5)

    print("KERNEL_OK")
</pallas_src>

<mosaic_0001>
module attributes {stable_mosaic.version = 11 : i64} {
  func.func @autofusion_kernel(%arg0: i32, %arg1: memref<8x128xf32, #tpu.memory_space<vmem>>, %arg2: memref<128x128xf32, #tpu.memory_space<vmem>>, %arg3: memref<1x128xf32, #tpu.memory_space<vmem>>, %arg4: memref<128x128xf32, #tpu.memory_space<vmem>>, %arg5: memref<1x128xf32, #tpu.memory_space<vmem>>, %arg6: memref<128x128xf32, #tpu.memory_space<vmem>>, %arg7: memref<1x128xf32, #tpu.memory_space<vmem>>, %arg8: memref<128x128xf32, #tpu.memory_space<vmem>>, %arg9: memref<1x128xf32, #tpu.memory_space<vmem>>, %arg10: memref<8x128xf32, #tpu.memory_space<vmem>>, %arg11: memref<1x1xf32, #tpu.memory_space<vmem>>) attributes {dimension_semantics = [#tpu.dimension_semantics<parallel>], iteration_bounds = array<i64: 1>, scalar_prefetch = 0 : i64, scratch_operands = 0 : i64, tpu.core_type = #tpu.core_type<tc>, window_params = [{transform_indices = @transform_0, window_bounds = array<i64: 8, 128>}, {pipeline_mode = #tpu.pipeline_mode<synchronous>, transform_indices = @transform_1, window_bounds = array<i64: 128, 128>}, {pipeline_mode = #tpu.pipeline_mode<synchronous>, transform_indices = @transform_2, window_bounds = array<i64: 1, 128>}, {pipeline_mode = #tpu.pipeline_mode<synchronous>, transform_indices = @transform_3, window_bounds = array<i64: 128, 128>}, {pipeline_mode = #tpu.pipeline_mode<synchronous>, transform_indices = @transform_4, window_bounds = array<i64: 1, 128>}, {pipeline_mode = #tpu.pipeline_mode<synchronous>, transform_indices = @transform_5, window_bounds = array<i64: 128, 128>}, {pipeline_mode = #tpu.pipeline_mode<synchronous>, transform_indices = @transform_6, window_bounds = array<i64: 1, 128>}, {pipeline_mode = #tpu.pipeline_mode<synchronous>, transform_indices = @transform_7, window_bounds = array<i64: 128, 128>}, {pipeline_mode = #tpu.pipeline_mode<synchronous>, transform_indices = @transform_8, window_bounds = array<i64: 1, 128>}, {transform_indices = @transform_9, window_bounds = array<i64: 8, 128>}, {transform_indices = @transform_10, window_bounds = array<i64: 1, 1>}]} {
    %c0 = arith.constant 0 : index
    %c0_0 = arith.constant 0 : index
    %0 = vector.load %arg1[%c0, %c0_0] : memref<8x128xf32, #tpu.memory_space<vmem>>, vector<8x128xf32>
    %c0_1 = arith.constant 0 : index
    %c0_2 = arith.constant 0 : index
    %1 = vector.load %arg2[%c0_1, %c0_2] : memref<128x128xf32, #tpu.memory_space<vmem>>, vector<128x128xf32>
    %cst = arith.constant dense<0.000000e+00> : vector<8x128xf32>
    %2 = tpu.matmul %0, %1, %cst {dimension_numbers = #tpu.dot_dimension_numbers<[1], [0], [0], [1], [0, 0, 1, 1], [], []>} : vector<8x128xf32>, vector<128x128xf32>, vector<8x128xf32> -> vector<8x128xf32>
    %c0_3 = arith.constant 0 : index
    %c0_4 = arith.constant 0 : index
    %3 = vector.load %arg3[%c0_3, %c0_4] : memref<1x128xf32, #tpu.memory_space<vmem>>, vector<1x128xf32>
    %4 = vector.broadcast %3 : vector<1x128xf32> to vector<8x128xf32>
    %5 = arith.addf %2, %4 : vector<8x128xf32>
    %6 = math.tanh %5 : vector<8x128xf32>
    %c0_5 = arith.constant 0 : index
    %c0_6 = arith.constant 0 : index
    %7 = vector.load %arg4[%c0_5, %c0_6] : memref<128x128xf32, #tpu.memory_space<vmem>>, vector<128x128xf32>
    %cst_7 = arith.constant dense<0.000000e+00> : vector<8x128xf32>
    %8 = tpu.matmul %6, %7, %cst_7 {dimension_numbers = #tpu.dot_dimension_numbers<[1], [0], [0], [1], [0, 0, 1, 1], [], []>} : vector<8x128xf32>, vector<128x128xf32>, vector<8x128xf32> -> vector<8x128xf32>
    %c0_8 = arith.constant 0 : index
    %c0_9 = arith.constant 0 : index
    %9 = vector.load %arg5[%c0_8, %c0_9] : memref<1x128xf32, #tpu.memory_space<vmem>>, vector<1x128xf32>
    %10 = vector.broadcast %9 : vector<1x128xf32> to vector<8x128xf32>
    %11 = arith.addf %8, %10 : vector<8x128xf32>
    %cst_10 = arith.constant 0.000000e+00 : f32
    %12 = vector.broadcast %cst_10 : f32 to vector<8x128xf32>
    %13 = arith.maximumf %11, %12 : vector<8x128xf32>
    %c0_11 = arith.constant 0 : index
    %c0_12 = arith.constant 0 : index
    %14 = vector.load %arg6[%c0_11, %c0_12] : memref<128x128xf32, #tpu.memory_space<vmem>>, vector<128x128xf32>
    %cst_13 = arith.constant dense<0.000000e+00> : vector<8x128xf32>
    %15 = tpu.matmul %13, %14, %cst_13 {dimension_numbers = #tpu.dot_dimension_numbers<[1], [0], [0], [1], [0, 0, 1, 1], [], []>} : vector<8x128xf32>, vector<128x128xf32>, vector<8x128xf32> -> vector<8x128xf32>
    %c0_14 = arith.constant 0 : index
    %c0_15 = arith.constant 0 : index
    %16 = vector.load %arg7[%c0_14, %c0_15] : memref<1x128xf32, #tpu.memory_space<vmem>>, vector<1x128xf32>
    %17 = vector.broadcast %16 : vector<1x128xf32> to vector<8x128xf32>
    %18 = arith.addf %15, %17 : vector<8x128xf32>
    %cst_16 = arith.constant 0.000000e+00 : f32
    %19 = vector.broadcast %cst_16 : f32 to vector<8x128xf32>
    %20 = arith.maximumf %18, %19 : vector<8x128xf32>
    %c0_17 = arith.constant 0 : index
    %c0_18 = arith.constant 0 : index
    %21 = vector.load %arg8[%c0_17, %c0_18] : memref<128x128xf32, #tpu.memory_space<vmem>>, vector<128x128xf32>
    %cst_19 = arith.constant dense<0.000000e+00> : vector<8x128xf32>
    %22 = tpu.matmul %20, %21, %cst_19 {dimension_numbers = #tpu.dot_dimension_numbers<[1], [0], [0], [1], [0, 0, 1, 1], [], []>} : vector<8x128xf32>, vector<128x128xf32>, vector<8x128xf32> -> vector<8x128xf32>
    %c0_20 = arith.constant 0 : index
    %c0_21 = arith.constant 0 : index
    %23 = vector.load %arg9[%c0_20, %c0_21] : memref<1x128xf32, #tpu.memory_space<vmem>>, vector<1x128xf32>
    %24 = vector.broadcast %23 : vector<1x128xf32> to vector<8x128xf32>
    %25 = arith.addf %22, %24 : vector<8x128xf32>
    %c0_22 = arith.constant 0 : index
    %c0_23 = arith.constant 0 : index
    %26 = vector.load %arg10[%c0_22, %c0_23] : memref<8x128xf32, #tpu.memory_space<vmem>>, vector<8x128xf32>
    tpu.vector_store %arg10[%c0_22, %c0_23], %13 {strides = array<i32>} : memref<8x128xf32, #tpu.memory_space<vmem>>, vector<8x128xf32>,
    %27 = arith.subf %25, %0 : vector<8x128xf32>
    %28 = arith.mulf %27, %27 : vector<8x128xf32>
    %cst_24 = arith.constant dense<0.000000e+00> : vector<8xf32>
    %29 = vector.multi_reduction <add>, %28, %cst_24 [1] : vector<8x128xf32> to vector<8xf32>
    %30 = vector.shape_cast %29 : vector<8xf32> to vector<8x1xf32>
    %cst_25 = arith.constant dense<0.000000e+00> : vector<1xf32>
    %31 = vector.multi_reduction <add>, %30, %cst_25 [0] : vector<8x1xf32> to vector<1xf32>
    %32 = vector.shape_cast %31 : vector<1xf32> to vector<1x1xf32>
    %c0_26 = arith.constant 0 : index
    %c0_27 = arith.constant 0 : index
    %33 = vector.load %arg11[%c0_26, %c0_27] : memref<1x1xf32, #tpu.memory_space<vmem>>, vector<1x1xf32>
    tpu.vector_store %arg11[%c0_26, %c0_27], %32 {strides = array<i32>} : memref<1x1xf32, #tpu.memory_space<vmem>>, vector<1x1xf32>,
    return
  }
  func.func @transform_0(%arg0: i32) -> (i32, i32) {
    %c0_i32 = arith.constant 0 : i32
    %c0_i32_0 = arith.constant 0 : i32
    return %arg0, %c0_i32 : i32, i32
  }
  func.func @transform_1(%arg0: i32) -> (i32, i32) {
    %c0_i32 = arith.constant 0 : i32
    %c0_i32_0 = arith.constant 0 : i32
    %c0_i32_1 = arith.constant 0 : i32
    return %c0_i32, %c0_i32_0 : i32, i32
  }
  func.func @transform_2(%arg0: i32) -> (i32, i32) {
    %c0_i32 = arith.constant 0 : i32
    %c0_i32_0 = arith.constant 0 : i32
    %c0_i32_1 = arith.constant 0 : i32
    return %c0_i32, %c0_i32_0 : i32, i32
  }
  func.func @transform_3(%arg0: i32) -> (i32, i32) {
    %c0_i32 = arith.constant 0 : i32
    %c0_i32_0 = arith.constant 0 : i32
    %c0_i32_1 = arith.constant 0 : i32
    return %c0_i32, %c0_i32_0 : i32, i32
  }
  func.func @transform_4(%arg0: i32) -> (i32, i32) {
    %c0_i32 = arith.constant 0 : i32
    %c0_i32_0 = arith.constant 0 : i32
    %c0_i32_1 = arith.constant 0 : i32
    return %c0_i32, %c0_i32_0 : i32, i32
  }
  func.func @transform_5(%arg0: i32) -> (i32, i32) {
    %c0_i32 = arith.constant 0 : i32
    %c0_i32_0 = arith.constant 0 : i32
    %c0_i32_1 = arith.constant 0 : i32
    return %c0_i32, %c0_i32_0 : i32, i32
  }
  func.func @transform_6(%arg0: i32) -> (i32, i32) {
    %c0_i32 = arith.constant 0 : i32
    %c0_i32_0 = arith.constant 0 : i32
    %c0_i32_1 = arith.constant 0 : i32
    return %c0_i32, %c0_i32_0 : i32, i32
  }
  func.func @transform_7(%arg0: i32) -> (i32, i32) {
    %c0_i32 = arith.constant 0 : i32
    %c0_i32_0 = arith.constant 0 : i32
    %c0_i32_1 = arith.constant 0 : i32
    return %c0_i32, %c0_i32_0 : i32, i32
  }
  func.func @transform_8(%arg0: i32) -> (i32, i32) {
    %c0_i32 = arith.constant 0 : i32
    %c0_i32_0 = arith.constant 0 : i32
    %c0_i32_1 = arith.constant 0 : i32
    return %c0_i32, %c0_i32_0 : i32, i32
  }
  func.func @transform_9(%arg0: i32) -> (i32, i32) {
    %c0_i32 = arith.constant 0 : i32
    %c0_i32_0 = arith.constant 0 : i32
    return %arg0, %c0_i32 : i32, i32
  }
  func.func @transform_10(%arg0: i32) -> (i32, i32) {
    %c0_i32 = arith.constant 0 : i32
    %c0_i32_0 = arith.constant 0 : i32
    return %arg0, %c0_i32 : i32, i32
  }
}

module attributes {stable_mosaic.version = 11 : i64} {
  func.func @autofusion_kernel(%arg0: i32, %arg1: memref<8x128xf32, #tpu.memory_space<vmem>>, %arg2: memref<128x128xf32, #tpu.memory_space<vmem>>, %arg3: memref<1x128xf32, #tpu.memory_space<vmem>>, %arg4: memref<128x128xf32, #tpu.memory_space<vmem>>, %arg5: memref<1x128xf32, #tpu.memory_space<vmem>>, %arg6: memref<128x128xf32, #tpu.memory_space<vmem>>, %arg7: memref<1x128xf32, #tpu.memory_space<vmem>>, %arg8: memref<128x128xf32, #tpu.memory_space<vmem>>, %arg9: memref<1x128xf32, #tpu.memory_space<vmem>>, %arg10: memref<8x128xf32, #tpu.memory_space<vmem>>, %arg11: memref<1x1xf32, #tpu.memory_space<vmem>>) attributes {dimension_semantics = [#tpu.dimension_semantics<parallel>], iteration_bounds = array<i64: 1>, scalar_prefetch = 0 : i64, scratch_operands = 0 : i64, tpu.core_type = #tpu.core_type<tc>, window_params = [{transform_indices = @transform_0, window_bounds = array<i64: 8, 128>}, {pipeline_mode = #tpu.pipeline_mode<synchronous>, transform_indices = @transform_1, window_bounds = array<i64: 128, 128>}, {pipeline_mode = #tpu.pipeline_mode<synchronous>, transform_indices = @transform_2, window_bounds = array<i64: 1, 128>}, {pipeline_mode = #tpu.pipeline_mode<synchronous>, transform_indices = @transform_3, window_bounds = array<i64: 128, 128>}, {pipeline_mode = #tpu.pipeline_mode<synchronous>, transform_indices = @transform_4, window_bounds = array<i64: 1, 128>}, {pipeline_mode = #tpu.pipeline_mode<synchronous>, transform_indices = @transform_5, window_bounds = array<i64: 128, 128>}, {pipeline_mode = #tpu.pipeline_mode<synchronous>, transform_indices = @transform_6, window_bounds = array<i64: 1, 128>}, {pipeline_mode = #tpu.pipeline_mode<synchronous>, transform_indices = @transform_7, window_bounds = array<i64: 128, 128>}, {pipeline_mode = #tpu.pipeline_mode<synchronous>, transform_indices = @transform_8, window_bounds = array<i64: 1, 128>}, {transform_indices = @transform_9, window_bounds = array<i64: 8, 128>}, {transform_indices = @transform_10, window_bounds = array<i64: 1, 1>}]} {
    %c0 = arith.constant 0 : index
    %c0_0 = arith.constant 0 : index
    %0 = vector.load %arg1[%c0, %c0_0] : memref<8x128xf32, #tpu.memory_space<vmem>>, vector<8x128xf32>
    %c0_1 = arith.constant 0 : index
    %c0_2 = arith.constant 0 : index
    %1 = vector.load %arg2[%c0_1, %c0_2] : memref<128x128xf32, #tpu.memory_space<vmem>>, vector<128x128xf32>
    %cst = arith.constant dense<0.000000e+00> : vector<8x128xf32>
    %2 = tpu.matmul %0, %1, %cst {dimension_numbers = #tpu.dot_dimension_numbers<[1], [0], [0], [1], [0, 0, 1, 1], [], []>} : vector<8x128xf32>, vector<128x128xf32>, vector<8x128xf32> -> vector<8x128xf32>
    %c0_3 = arith.constant 0 : index
    %c0_4 = arith.constant 0 : index
    %3 = vector.load %arg3[%c0_3, %c0_4] : memref<1x128xf32, #tpu.memory_space<vmem>>, vector<1x128xf32>
    %4 = vector.broadcast %3 : vector<1x128xf32> to vector<8x128xf32>
    %5 = arith.addf %2, %4 : vector<8x128xf32>
    %6 = math.tanh %5 : vector<8x128xf32>
    %c0_5 = arith.constant 0 : index
    %c0_6 = arith.constant 0 : index
    %7 = vector.load %arg4[%c0_5, %c0_6] : memref<128x128xf32, #tpu.memory_space<vmem>>, vector<128x128xf32>
    %cst_7 = arith.constant dense<0.000000e+00> : vector<8x128xf32>
    %8 = tpu.matmul %6, %7, %cst_7 {dimension_numbers = #tpu.dot_dimension_numbers<[1], [0], [0], [1], [0, 0, 1, 1], [], []>} : vector<8x128xf32>, vector<128x128xf32>, vector<8x128xf32> -> vector<8x128xf32>
    %c0_8 = arith.constant 0 : index
    %c0_9 = arith.constant 0 : index
    %9 = vector.load %arg5[%c0_8, %c0_9] : memref<1x128xf32, #tpu.memory_space<vmem>>, vector<1x128xf32>
    %10 = vector.broadcast %9 : vector<1x128xf32> to vector<8x128xf32>
    %11 = arith.addf %8, %10 : vector<8x128xf32>
    %cst_10 = arith.constant 0.000000e+00 : f32
    %12 = vector.broadcast %cst_10 : f32 to vector<8x128xf32>
    %13 = arith.maximumf %11, %12 : vector<8x128xf32>
    %c0_11 = arith.constant 0 : index
    %c0_12 = arith.constant 0 : index
    %14 = vector.load %arg6[%c0_11, %c0_12] : memref<128x128xf32, #tpu.memory_space<vmem>>, vector<128x128xf32>
    %cst_13 = arith.constant dense<0.000000e+00> : vector<8x128xf32>
    %15 = tpu.matmul %13, %14, %cst_13 {dimension_numbers = #tpu.dot_dimension_numbers<[1], [0], [0], [1], [0, 0, 1, 1], [], []>} : vector<8x128xf32>, vector<128x128xf32>, vector<8x128xf32> -> vector<8x128xf32>
    %c0_14 = arith.constant 0 : index
    %c0_15 = arith.constant 0 : index
    %16 = vector.load %arg7[%c0_14, %c0_15] : memref<1x128xf32, #tpu.memory_space<vmem>>, vector<1x128xf32>
    %17 = vector.broadcast %16 : vector<1x128xf32> to vector<8x128xf32>
    %18 = arith.addf %15, %17 : vector<8x128xf32>
    %cst_16 = arith.constant 0.000000e+00 : f32
    %19 = vector.broadcast %cst_16 : f32 to vector<8x128xf32>
    %20 = arith.maximumf %18, %19 : vector<8x128xf32>
    %c0_17 = arith.constant 0 : index
    %c0_18 = arith.constant 0 : index
    %21 = vector.load %arg8[%c0_17, %c0_18] : memref<128x128xf32, #tpu.memory_space<vmem>>, vector<128x128xf32>
    %cst_19 = arith.constant dense<0.000000e+00> : vector<8x128xf32>
    %22 = tpu.matmul %20, %21, %cst_19 {dimension_numbers = #tpu.dot_dimension_numbers<[1], [0], [0], [1], [0, 0, 1, 1], [], []>} : vector<8x128xf32>, vector<128x128xf32>, vector<8x128xf32> -> vector<8x128xf32>
    %c0_20 = arith.constant 0 : index
    %c0_21 = arith.constant 0 : index
    %23 = vector.load %arg9[%c0_20, %c0_21] : memref<1x128xf32, #tpu.memory_space<vmem>>, vector<1x128xf32>
    %24 = vector.broadcast %23 : vector<1x128xf32> to vector<8x128xf32>
    %25 = arith.addf %22, %24 : vector<8x128xf32>
    %c0_22 = arith.constant 0 : index
    %c0_23 = arith.constant 0 : index
    %26 = vector.load %arg10[%c0_22, %c0_23] : memref<8x128xf32, #tpu.memory_space<vmem>>, vector<8x128xf32>
    tpu.vector_store %arg10[%c0_22, %c0_23], %13 {strides = array<i32>} : memref<8x128xf32, #tpu.memory_space<vmem>>, vector<8x128xf32>,
    %27 = arith.subf %25, %0 : vector<8x128xf32>
    %28 = arith.mulf %27, %27 : vector<8x128xf32>
    %cst_24 = arith.constant dense<0.000000e+00> : vector<8xf32>
    %29 = vector.multi_reduction <add>, %28, %cst_24 [1] : vector<8x128xf32> to vector<8xf32>
    %30 = vector.shape_cast %29 : vector<8xf32> to vector<8x1xf32>
    %cst_25 = arith.constant dense<0.000000e+00> : vector<1xf32>
    %31 = vector.multi_reduction <add>, %30, %cst_25 [0] : vector<8x1xf32> to vector<1xf32>
    %32 = vector.shape_cast %31 : vector<1xf32> to vector<1x1xf32>
    %c0_26 = arith.constant 0 : index
    %c0_27 = arith.constant 0 : index
    %33 = vector.load %arg11[%c0_26, %c0_27] : memref<1x1xf32, #tpu.memory_space<vmem>>, vector<1x1xf32>
    tpu.vector_store %arg11[%c0_26, %c0_27], %32 {strides = array<i32>} : memref<1x1xf32, #tpu.memory_space<vmem>>, vector<1x1xf32>,
    return
  }
  func.func @transform_0(%arg0: i32) -> (i32, i32) {
    %c0_i32 = arith.constant 0 : i32
    %c0_i32_0 = arith.constant 0 : i32
    return %arg0, %c0_i32 : i32, i32
  }
  func.func @transform_1(%arg0: i32) -> (i32, i32) {
    %c0_i32 = arith.constant 0 : i32
    %c0_i32_0 = arith.constant 0 : i32
    %c0_i32_1 = arith.constant 0 : i32
    return %c0_i32, %c0_i32_0 : i32, i32
  }
  func.func @transform_2(%arg0: i32) -> (i32, i32) {
    %c0_i32 = arith.constant 0 : i32
    %c0_i32_0 = arith.constant 0 : i32
    %c0_i32_1 = arith.constant 0 : i32
    return %c0_i32, %c0_i32_0 : i32, i32
  }
  func.func @transform_3(%arg0: i32) -> (i32, i32) {
    %c0_i32 = arith.constant 0 : i32
    %c0_i32_0 = arith.constant 0 : i32
    %c0_i32_1 = arith.constant 0 : i32
    return %c0_i32, %c0_i32_0 : i32, i32
  }
  func.func @transform_4(%arg0: i32) -> (i32, i32) {
    %c0_i32 = arith.constant 0 : i32
    %c0_i32_0 = arith.constant 0 : i32
    %c0_i32_1 = arith.constant 0 : i32
    return %c0_i32, %c0_i32_0 : i32, i32
  }
  func.func @transform_5(%arg0: i32) -> (i32, i32) {
    %c0_i32 = arith.constant 0 : i32
    %c0_i32_0 = arith.constant 0 : i32
    %c0_i32_1 = arith.constant 0 : i32
    return %c0_i32, %c0_i32_0 : i32, i32
  }
  func.func @transform_6(%arg0: i32) -> (i32, i32) {
    %c0_i32 = arith.constant 0 : i32
    %c0_i32_0 = arith.constant 0 : i32
    %c0_i32_1 = arith.constant 0 : i32
    return %c0_i32, %c0_i32_0 : i32, i32
  }
  func.func @transform_7(%arg0: i32) -> (i32, i32) {
    %c0_i32 = arith.constant 0 : i32
    %c0_i32_0 = arith.constant 0 : i32
    %c0_i32_1 = arith.constant 0 : i32
    return %c0_i32, %c0_i32_0 : i32, i32
  }
  func.func @transform_8(%arg0: i32) -> (i32, i32) {
    %c0_i32 = arith.constant 0 : i32
    %c0_i32_0 = arith.constant 0 : i32
    %c0_i32_1 = arith.constant 0 : i32
    return %c0_i32, %c0_i32_0 : i32, i32
  }
  func.func @transform_9(%arg0: i32) -> (i32, i32) {
    %c0_i32 = arith.constant 0 : i32
    %c0_i32_0 = arith.constant 0 : i32
    return %arg0, %c0_i32 : i32, i32
  }
  func.func @transform_10(%arg0: i32) -> (i32, i32) {
    %c0_i32 = arith.constant 0 : i32
    %c0_i32_0 = arith.constant 0 : i32
    return %arg0, %c0_i32 : i32, i32
  }
}

</mosaic_0001>

<bundles_post_ra>
// kernel: autofusion_forward.1
= control target key start
LH: loop header
LB: loop body
LE: loop exit
PB: predicated region body
PF: predicated region fallthrough
CT: control target
= control target key end

     0   :  { %16 = vsyncpa [#allocation3], 0  ;;  %s579_s0 = inlined_call_operand.vmem [shape: f32[8,128], index: 0, kind: input, shape index: {}]   ;;  %s580_s1 = inlined_call_operand.vmem [shape: f32[128,128], index: 1, kind: input, shape index: {}]   ;;  %s581_s2 = inlined_call_operand.vmem [shape: f32[1,128], index: 2, kind: input, shape index: {}]   ;;  %s582_s3 = inlined_call_operand.vmem [shape: f32[128,128], index: 3, kind: input, shape index: {}]   ;;  %s583_s4 = inlined_call_operand.vmem [shape: f32[1,128], index: 4, kind: input, shape index: {}]   ;;  %s584_s5 = inlined_call_operand.vmem [shape: f32[128,128], index: 5, kind: input, shape index: {}]   ;;  %s585_s6 = inlined_call_operand.vmem [shape: f32[1,128], index: 6, kind: input, shape index: {}]   ;;  %s586_s7 = inlined_call_operand.vmem [shape: f32[128,128], index: 7, kind: input, shape index: {}]   ;;  %s587_s8 = inlined_call_operand.vmem [shape: f32[1,128], index: 8, kind: input, shape index: {}]   ;;  %s588_s9 = inlined_call_operand.hbm [shape: f32[8,128], index: 9, kind: output, shape index: {0}]   ;;  %s589_s10 = inlined_call_operand.hbm [shape: f32[1,1], index: 10, kind: output, shape index: {1}]  }
   0x1   :  { %v52_v0 = vld [vmem:[%s580_s1 + $0x78] sm:$0xff]  ;;  %v51_v1 = vld [vmem:[%s580_s1 + $0x70] sm:$0xff]  ;;  %v50_v2 = vld [vmem:[%s580_s1 + $0x68] sm:$0xff] }
   0x2   :  { %57 = vmatpush.msra.mxu0 %v52_v0  ;;  %v49_v3 = vld [vmem:[%s580_s1 + $0x60] sm:$0xff]  ;;  %v93_v4 = vld [vmem:[%s582_s3 + $0x78] sm:$0xff]  ;;  %v92_v6 = vld [vmem:[%s582_s3 + $0x70] sm:$0xff] }
   0x3   :  { %v48_v5 = vld [vmem:[%s580_s1 + $0x58] sm:$0xff]  ;;  %98 = vmatpush.msra.mxu1 %v93_v4  ;;  %v91_v7 = vld [vmem:[%s582_s3 + $0x68] sm:$0xff]  ;;  %v47_v8 = vld [vmem:[%s580_s1 + $0x50] sm:$0xff] }
   0x4   :  { %58 = vmatpush.msra.mxu0 %v51_v1  ;;  %v46_v9 = vld [vmem:[%s580_s1 + $0x48] sm:$0xff]  ;;  %v90_v10 = vld [vmem:[%s582_s3 + $0x60] sm:$0xff]  ;;  %v89_v11 = vld [vmem:[%s582_s3 + $0x58] sm:$0xff] }
   0x5   :  { %99 = vmatpush.msra.mxu1 %v92_v6 }
   0x6   :  { %59 = vmatpush.msra.mxu0 %v50_v2 }
   0x7   :  { %100 = vmatpush.msra.mxu1 %v91_v7 }
   0x8   :  { %60 = vmatpush.msra.mxu0 %v49_v3 }
   0xa   :  { %61 = vmatpush.msra.mxu0 %v48_v5 }
   0xc   :  { %62 = vmatpush.msra.mxu0 %v47_v8 }
   0xd   :  { %17 = vsyncpa [#allocation5], 0  ;;  %v45_v12 = vld [vmem:[%s580_s1 + $0x40] sm:$0xff]  ;;  %101 = vmatpush.msra.mxu1 %v90_v10  ;;  %v88_v13 = vld [vmem:[%s582_s3 + $0x50] sm:$0xff]  ;;  %s220_s16 = sshll.u32 %s588_s9, 4  ;;  %s305_s17 = smov [#allocation2]   ;;  %s221_s16 = int_to_ptr.hbm [resolvable:$true] %s220_s16 }
   0xe   :  { %63 = vmatpush.msra.mxu0 %v46_v9  ;;  %v44_v14 = vld [vmem:[%s580_s1 + $0x38] sm:$0xff]  ;;  %v87_v15 = vld [vmem:[%s582_s3 + $0x48] sm:$0xff]  ;;  %v43_v16 = vld [vmem:[%s580_s1 + $0x30] sm:$0xff]  ;;  %s218_s18 = sshll.u32 %s305_s17, 4  ;;  %s231_s21 = sshll.u32 %s589_s10, 4  ;;  %vm211_vm0 = vcmask 0   ;;  %s219_s18 = int_to_ptr.vmem [resolvable:$true] %s218_s18  ;;  %s232_s21 = int_to_ptr.hbm [resolvable:$true] %s231_s21 }
   0xf   :  { %102 = vmatpush.msra.mxu1 %v89_v11  ;;  %v86_v17 = vld [vmem:[%s582_s3 + $0x40] sm:$0xff]  ;;  %v42_v18 = vld [vmem:[%s580_s1 + $0x28] sm:$0xff]  ;;  %v85_v19 = vld [vmem:[%s582_s3 + $0x38] sm:$0xff] }
  0x10   :  { %64 = vmatpush.msra.mxu0 %v45_v12  ;;  %v41_v20 = vld [vmem:[%s580_s1 + $0x20] sm:$0xff]  ;;  %v84_v21 = vld [vmem:[%s582_s3 + $0x30] sm:$0xff]  ;;  %v40_v22 = vld [vmem:[%s580_s1 + $0x18] sm:$0xff] }
  0x11   :  { %103 = vmatpush.msra.mxu1 %v88_v13  ;;  %v83_v23 = vld [vmem:[%s582_s3 + $0x28] sm:$0xff]  ;;  %v39_v24 = vld [vmem:[%s580_s1 + $0x10] sm:$0xff]  ;;  %v37_v26 = vld [vmem:[%s580_s1] sm:$0xff] }
  0x12   :  { %65 = vmatpush.msra.mxu0 %v44_v14  ;;  %v38_v25 = vld [vmem:[%s580_s1 + $0x8] sm:$0xff]  ;;  %v446_v27 = vld [vmem:[%s579_s0] sm:$0xff]  ;;  %v81_v29 = vld [vmem:[%s582_s3 + $0x18] sm:$0xff] }
  0x13   :  { %104 = vmatpush.msra.mxu1 %v87_v15  ;;  %v82_v28 = vld [vmem:[%s582_s3 + $0x20] sm:$0xff]  ;;  %v80_v30 = vld [vmem:[%s582_s3 + $0x10] sm:$0xff]  ;;  %v79_v31 = vld [vmem:[%s582_s3 + $0x8] sm:$0xff] }
  0x14   :  { %66 = vmatpush.msra.mxu0 %v43_v16  ;;  %v78_v32 = vld [vmem:[%s582_s3] sm:$0xff]  ;;  %v134_v33 = vld [vmem:[%s584_s5 + $0x78] sm:$0xff]  ;;  %v133_v34 = vld [vmem:[%s584_s5 + $0x70] sm:$0xff] }
  0x15   :  { %105 = vmatpush.msra.mxu1 %v86_v17  ;;  %139 = vmatpush.msra.mxu2 %v134_v33  ;;  %v132_v35 = vld [vmem:[%s584_s5 + $0x68] sm:$0xff]  ;;  %v131_v36 = vld [vmem:[%s584_s5 + $0x60] sm:$0xff]  ;;  %v130_v37 = vld [vmem:[%s584_s5 + $0x58] sm:$0xff] }
  0x16   :  { %67 = vmatpush.msra.mxu0 %v42_v18  ;;  %v129_v38 = vld [vmem:[%s584_s5 + $0x50] sm:$0xff]  ;;  %v128_v39 = vld [vmem:[%s584_s5 + $0x48] sm:$0xff]  ;;  %v127_v40 = vld [vmem:[%s584_s5 + $0x40] sm:$0xff] }
  0x17   :  { %106 = vmatpush.msra.mxu1 %v85_v19  ;;  %140 = vmatpush.msra.mxu2 %v133_v34  ;;  %v126_v41 = vld [vmem:[%s584_s5 + $0x38] sm:$0xff]  ;;  %v125_v42 = vld [vmem:[%s584_s5 + $0x30] sm:$0xff]  ;;  %v124_v43 = vld [vmem:[%s584_s5 + $0x28] sm:$0xff] }
  0x18   :  { %68 = vmatpush.msra.mxu0 %v41_v20  ;;  %v247_v44 = vld [vmem:[%s581_s2] ss:$0 sm:$0xff]  ;;  %v122_v47 = vld [vmem:[%s584_s5 + $0x18] sm:$0xff]  ;;  %v121_v50 = vld [vmem:[%s584_s5 + $0x10] sm:$0xff] }
  0x19   :  { %107 = vmatpush.msra.mxu1 %v84_v21  ;;  %141 = vmatpush.msra.mxu2 %v132_v35  ;;  %v123_v45 = vld [vmem:[%s584_s5 + $0x20] sm:$0xff]  ;;  %v120_v51 = vld [vmem:[%s584_s5 + $0x8] sm:$0xff]  ;;  %v175_v53 = vld [vmem:[%s586_s7 + $0x78] sm:$0xff] }
  0x1a   :  { %69 = vmatpush.msra.mxu0 %v40_v22  ;;  %v119_v52 = vld [vmem:[%s584_s5] sm:$0xff]  ;;  %v174_v54 = vld [vmem:[%s586_s7 + $0x70] sm:$0xff]  ;;  %180 = vmatpush.msra.mxu3 %v175_v53  ;;  %v173_v55 = vld [vmem:[%s586_s7 + $0x68] sm:$0xff] }
  0x1b   :  { %108 = vmatpush.msra.mxu1 %v83_v23  ;;  %142 = vmatpush.msra.mxu2 %v131_v36  ;;  %v172_v56 = vld [vmem:[%s586_s7 + $0x60] sm:$0xff]  ;;  %v171_v57 = vld [vmem:[%s586_s7 + $0x58] sm:$0xff]  ;;  %v170_v58 = vld [vmem:[%s586_s7 + $0x50] sm:$0xff] }
  0x1c   :  { %70 = vmatpush.msra.mxu0 %v39_v24  ;;  %181 = vmatpush.msra.mxu3 %v174_v54  ;;  %v169_v59 = vld [vmem:[%s586_s7 + $0x48] sm:$0xff]  ;;  %v168_v60 = vld [vmem:[%s586_s7 + $0x40] sm:$0xff]  ;;  %v167_v61 = vld [vmem:[%s586_s7 + $0x38] sm:$0xff] }
  0x1d   :  { %109 = vmatpush.msra.mxu1 %v82_v28  ;;  %143 = vmatpush.msra.mxu2 %v130_v37  ;;  %v166_v62 = vld [vmem:[%s586_s7 + $0x30] sm:$0xff]  ;;  %v165_v63 = vld [vmem:[%s586_s7 + $0x28] sm:$0xff]  ;;  %v164_v0 = vld [vmem:[%s586_s7 + $0x20] sm:$0xff] }
  0x1e   :  { %71 = vmatpush.msra.mxu0 %v38_v25  ;;  %182 = vmatpush.msra.mxu3 %v173_v55  ;;  %v163_v1 = vld [vmem:[%s586_s7 + $0x18] sm:$0xff]  ;;  %v248_v2 = vld [vmem:[%s583_s4] ss:$0 sm:$0xff]  ;;  %v162_v6 = vld [vmem:[%s586_s7 + $0x10] sm:$0xff] }
  0x1f   :  { %110 = vmatpush.msra.mxu1 %v81_v29  ;;  %144 = vmatpush.msra.mxu2 %v129_v38  ;;  %v161_v7 = vld [vmem:[%s586_s7 + $0x8] sm:$0xff]  ;;  %v160_v8 = vld [vmem:[%s586_s7] sm:$0xff] }
  0x20   :  { %72 = vmatpush.msra.mxu0 %v37_v26  ;;  %183 = vmatpush.msra.mxu3 %v172_v56  ;;  %v249_v9 = vld [vmem:[%s585_s6] ss:$0 sm:$0xff]  ;;  %s306_s6 = smov [#allocation4]  }
  0x21   :  { %73 = vmatmul.f32.vlgmr.msra.gmra.mxu0 %v446_v27  ;;  %111 = vmatpush.msra.mxu1 %v80_v30  ;;  %v250_v13 = vld [vmem:[%s587_s8] ss:$0 sm:$0xff]  ;;  %s229_s8 = sshll.u32 %s306_s6, 4  ;;  %s230_s8 = int_to_ptr.vmem [resolvable:$true] %s229_s8 }
  0x22   :  { %145 = vmatpush.msra.mxu2 %v128_v39  ;;  %184 = vmatpush.msra.mxu3 %v171_v57 }
  0x23   :  { %112 = vmatpush.msra.mxu1 %v79_v31 }
  0x24   :  { %146 = vmatpush.msra.mxu2 %v127_v40  ;;  %185 = vmatpush.msra.mxu3 %v170_v58 }
  0x25   :  { %113 = vmatpush.msra.mxu1 %v78_v32 }
  0x26   :  { %147 = vmatpush.msra.mxu2 %v126_v41  ;;  %186 = vmatpush.msra.mxu3 %v169_v59 }
  0x28   :  { %148 = vmatpush.msra.mxu2 %v125_v42  ;;  %187 = vmatpush.msra.mxu3 %v168_v60 }
  0x2a   :  { %149 = vmatpush.msra.mxu2 %v124_v43  ;;  %188 = vmatpush.msra.mxu3 %v167_v61 }
  0x2c   :  { %150 = vmatpush.msra.mxu2 %v123_v45  ;;  %189 = vmatpush.msra.mxu3 %v166_v62 }
  0x2e   :  { %151 = vmatpush.msra.mxu2 %v122_v47  ;;  %190 = vmatpush.msra.mxu3 %v165_v63 }
  0x30   :  { %152 = vmatpush.msra.mxu2 %v121_v50  ;;  %191 = vmatpush.msra.mxu3 %v164_v0 }
  0x32   :  { %153 = vmatpush.msra.mxu2 %v120_v51  ;;  %192 = vmatpush.msra.mxu3 %v163_v1 }
  0x34   :  { %154 = vmatpush.msra.mxu2 %v119_v52  ;;  %193 = vmatpush.msra.mxu3 %v162_v6 }
  0x36   :  { %194 = vmatpush.msra.mxu3 %v161_v7 }
  0x38   :  { %195 = vmatpush.msra.mxu3 %v160_v8 }
  0x9e   :  { %v74_v46 = vpop.f32.mrf.mxu0 }
  0x9f   :  { %v75_v48 = vadd.f32 %v247_v44, %v74_v46 }
  0xa1   :  { %251 = vtanh.f32 %v75_v48 }
  0xa7   :  { %v252_v49 = vpop.eup %251 }
  0xa8   :  { %114 = vmatmul.f32.vlgmr.msra.gmra.mxu1 %v252_v49 }
 0x125   :  { %v115_v3 = vpop.f32.mrf.mxu1 }
 0x126   :  { %v116_v4 = vadd.f32 %v248_v2, %v115_v3 }
 0x128   :  { %v118_v5 = vmax.f32 %v116_v4, 0.0 }
 0x12a   :  { %200 = vst [vmem:[#allocation2] sm:$0xff] %v118_v5  ;;  %155 = vmatmul.f32.vlgmr.msra.gmra.mxu2 %v118_v5 }
 0x12b   :  { %223 = dma.vmem_to_hbm [thread:$0]  %s219_s18, 128, %s221_s16, [#allocation3]  }
 0x1ad   :  { %v156_v10 = vpop.f32.mrf.mxu2 }
 0x1ae   :  { %v157_v11 = vadd.f32 %v249_v9, %v156_v10 }
 0x1b0   :  { %v159_v12 = vmax.f32 %v157_v11, 0.0 }
 0x1b2   :  { %196 = vmatmul.f32.vlgmr.msra.gmra.mxu3 %v159_v12 }
 0x235   :  { %v197_v14 = vpop.f32.mrf.mxu3 }
 0x236   :  { %v198_v15 = vadd.f32 %v250_v13, %v197_v14 }
 0x238   :  { %v201_v16 = vsub.f32 %v198_v15, %v446_v27 }
 0x23a   :  { %v202_v17 = vmul.f32 %v201_v16, %v201_v16 }
 0x23c   :  { %203 = vadd.xlane.f32.xlu0 %v202_v17 }
 0x2af   :  { %v204_v18 = vpop.xlane.xlu0 %203 }
 0x2b0   :  { %v205_v19 = vrot.slane %v204_v18, 4 }
 0x2b2   :  { %v206_v20 = vadd.f32 %v205_v19, %v204_v18 }
 0x2b4   :  { %v207_v21 = vrot.slane %v206_v20, 2 }
 0x2b6   :  { %v208_v22 = vadd.f32 %v207_v21, %v206_v20 }
 0x2b8   :  { %v209_v23 = vrot.slane %v208_v22, 1 }
 0x2ba   :  { %v210_v24 = vadd.f32 %v209_v23, %v208_v22 }
 0x2bc   :  { %212 = vst.msk [vmem:[#allocation4] sm:$0x1] %vm211_vm0, %v210_v24 }
 0x2bd   :  { %234 = dma.vmem_to_hbm [thread:$0]  %s230_s8, 16, %s232_s21, [#allocation5]  }
 0x2be   :  { %301 = dma.done.wait [#allocation3], 128  }
 0x2bf   :  { %302 = vsyncadd [#allocation3], 4294967168 }
 0x2c0   :  { %303 = dma.done.wait [#allocation5], 16  }
 0x2c1   :  { %304 = vsyncadd [#allocation5], 4294967280 }
 0x2c2   :  { %243 = vsyncpa [#allocation3], 1 }
 0x2c3   :  { %244 = vsyncpa [#allocation5], 1 }

// kernel: autofusion_forward.1
= control target key start
LH: loop header
LB: loop body
LE: loop exit
PB: predicated region body
PF: predicated region fallthrough
CT: control target
= control target key end

     0   :  { %16 = vsyncpa [#allocation3], 0  ;;  %s579_s0 = inlined_call_operand.vmem [shape: f32[8,128], index: 0, kind: input, shape index: {}]   ;;  %s580_s1 = inlined_call_operand.vmem [shape: f32[128,128], index: 1, kind: input, shape index: {}]   ;;  %s581_s2 = inlined_call_operand.vmem [shape: f32[1,128], index: 2, kind: input, shape index: {}]   ;;  %s582_s3 = inlined_call_operand.vmem [shape: f32[128,128], index: 3, kind: input, shape index: {}]   ;;  %s583_s4 = inlined_call_operand.vmem [shape: f32[1,128], index: 4, kind: input, shape index: {}]   ;;  %s584_s5 = inlined_call_operand.vmem [shape: f32[128,128], index: 5, kind: input, shape index: {}]   ;;  %s585_s6 = inlined_call_operand.vmem [shape: f32[1,128], index: 6, kind: input, shape index: {}]   ;;  %s586_s7 = inlined_call_operand.vmem [shape: f32[128,128], index: 7, kind: input, shape index: {}]   ;;  %s587_s8 = inlined_call_operand.vmem [shape: f32[1,128], index: 8, kind: input, shape index: {}]   ;;  %s588_s9 = inlined_call_operand.hbm [shape: f32[8,128], index: 9, kind: output, shape index: {0}]   ;;  %s589_s10 = inlined_call_operand.hbm [shape: f32[1,1], index: 10, kind: output, shape index: {1}]  }
   0x1   :  { %v52_v0 = vld [vmem:[%s580_s1 + $0x78] sm:$0xff]  ;;  %v51_v1 = vld [vmem:[%s580_s1 + $0x70] sm:$0xff]  ;;  %v50_v2 = vld [vmem:[%s580_s1 + $0x68] sm:$0xff] }
   0x2   :  { %57 = vmatpush.msra.mxu0 %v52_v0  ;;  %v49_v3 = vld [vmem:[%s580_s1 + $0x60] sm:$0xff]  ;;  %v93_v4 = vld [vmem:[%s582_s3 + $0x78] sm:$0xff]  ;;  %v92_v6 = vld [vmem:[%s582_s3 + $0x70] sm:$0xff] }
   0x3   :  { %v48_v5 = vld [vmem:[%s580_s1 + $0x58] sm:$0xff]  ;;  %98 = vmatpush.msra.mxu1 %v93_v4  ;;  %v91_v7 = vld [vmem:[%s582_s3 + $0x68] sm:$0xff]  ;;  %v47_v8 = vld [vmem:[%s580_s1 + $0x50] sm:$0xff] }
   0x4   :  { %58 = vmatpush.msra.mxu0 %v51_v1  ;;  %v46_v9 = vld [vmem:[%s580_s1 + $0x48] sm:$0xff]  ;;  %v90_v10 = vld [vmem:[%s582_s3 + $0x60] sm:$0xff]  ;;  %v89_v11 = vld [vmem:[%s582_s3 + $0x58] sm:$0xff] }
   0x5   :  { %99 = vmatpush.msra.mxu1 %v92_v6 }
   0x6   :  { %59 = vmatpush.msra.mxu0 %v50_v2 }
   0x7   :  { %100 = vmatpush.msra.mxu1 %v91_v7 }
   0x8   :  { %60 = vmatpush.msra.mxu0 %v49_v3 }
   0xa   :  { %61 = vmatpush.msra.mxu0 %v48_v5 }
   0xc   :  { %62 = vmatpush.msra.mxu0 %v47_v8 }
   0xd   :  { %17 = vsyncpa [#allocation5], 0  ;;  %v45_v12 = vld [vmem:[%s580_s1 + $0x40] sm:$0xff]  ;;  %101 = vmatpush.msra.mxu1 %v90_v10  ;;  %v88_v13 = vld [vmem:[%s582_s3 + $0x50] sm:$0xff]  ;;  %s220_s16 = sshll.u32 %s588_s9, 4  ;;  %s305_s17 = smov [#allocation2]   ;;  %s221_s16 = int_to_ptr.hbm [resolvable:$true] %s220_s16 }
   0xe   :  { %63 = vmatpush.msra.mxu0 %v46_v9  ;;  %v44_v14 = vld [vmem:[%s580_s1 + $0x38] sm:$0xff]  ;;  %v87_v15 = vld [vmem:[%s582_s3 + $0x48] sm:$0xff]  ;;  %v43_v16 = vld [vmem:[%s580_s1 + $0x30] sm:$0xff]  ;;  %s218_s18 = sshll.u32 %s305_s17, 4  ;;  %s231_s21 = sshll.u32 %s589_s10, 4  ;;  %vm211_vm0 = vcmask 0   ;;  %s219_s18 = int_to_ptr.vmem [resolvable:$true] %s218_s18  ;;  %s232_s21 = int_to_ptr.hbm [resolvable:$true] %s231_s21 }
   0xf   :  { %102 = vmatpush.msra.mxu1 %v89_v11  ;;  %v86_v17 = vld [vmem:[%s582_s3 + $0x40] sm:$0xff]  ;;  %v42_v18 = vld [vmem:[%s580_s1 + $0x28] sm:$0xff]  ;;  %v85_v19 = vld [vmem:[%s582_s3 + $0x38] sm:$0xff] }
  0x10   :  { %64 = vmatpush.msra.mxu0 %v45_v12  ;;  %v41_v20 = vld [vmem:[%s580_s1 + $0x20] sm:$0xff]  ;;  %v84_v21 = vld [vmem:[%s582_s3 + $0x30] sm:$0xff]  ;;  %v40_v22 = vld [vmem:[%s580_s1 + $0x18] sm:$0xff] }
  0x11   :  { %103 = vmatpush.msra.mxu1 %v88_v13  ;;  %v83_v23 = vld [vmem:[%s582_s3 + $0x28] sm:$0xff]  ;;  %v39_v24 = vld [vmem:[%s580_s1 + $0x10] sm:$0xff]  ;;  %v37_v26 = vld [vmem:[%s580_s1] sm:$0xff] }
  0x12   :  { %65 = vmatpush.msra.mxu0 %v44_v14  ;;  %v38_v25 = vld [vmem:[%s580_s1 + $0x8] sm:$0xff]  ;;  %v446_v27 = vld [vmem:[%s579_s0] sm:$0xff]  ;;  %v81_v29 = vld [vmem:[%s582_s3 + $0x18] sm:$0xff] }
  0x13   :  { %104 = vmatpush.msra.mxu1 %v87_v15  ;;  %v82_v28 = vld [vmem:[%s582_s3 + $0x20] sm:$0xff]  ;;  %v80_v30 = vld [vmem:[%s582_s3 + $0x10] sm:$0xff]  ;;  %v79_v31 = vld [vmem:[%s582_s3 + $0x8] sm:$0xff] }
  0x14   :  { %66 = vmatpush.msra.mxu0 %v43_v16  ;;  %v78_v32 = vld [vmem:[%s582_s3] sm:$0xff]  ;;  %v134_v33 = vld [vmem:[%s584_s5 + $0x78] sm:$0xff]  ;;  %v133_v34 = vld [vmem:[%s584_s5 + $0x70] sm:$0xff] }
  0x15   :  { %105 = vmatpush.msra.mxu1 %v86_v17  ;;  %139 = vmatpush.msra.mxu2 %v134_v33  ;;  %v132_v35 = vld [vmem:[%s584_s5 + $0x68] sm:$0xff]  ;;  %v131_v36 = vld [vmem:[%s584_s5 + $0x60] sm:$0xff]  ;;  %v130_v37 = vld [vmem:[%s584_s5 + $0x58] sm:$0xff] }
  0x16   :  { %67 = vmatpush.msra.mxu0 %v42_v18  ;;  %v129_v38 = vld [vmem:[%s584_s5 + $0x50] sm:$0xff]  ;;  %v128_v39 = vld [vmem:[%s584_s5 + $0x48] sm:$0xff]  ;;  %v127_v40 = vld [vmem:[%s584_s5 + $0x40] sm:$0xff] }
  0x17   :  { %106 = vmatpush.msra.mxu1 %v85_v19  ;;  %140 = vmatpush.msra.mxu2 %v133_v34  ;;  %v126_v41 = vld [vmem:[%s584_s5 + $0x38] sm:$0xff]  ;;  %v125_v42 = vld [vmem:[%s584_s5 + $0x30] sm:$0xff]  ;;  %v124_v43 = vld [vmem:[%s584_s5 + $0x28] sm:$0xff] }
  0x18   :  { %68 = vmatpush.msra.mxu0 %v41_v20  ;;  %v247_v44 = vld [vmem:[%s581_s2] ss:$0 sm:$0xff]  ;;  %v122_v47 = vld [vmem:[%s584_s5 + $0x18] sm:$0xff]  ;;  %v121_v50 = vld [vmem:[%s584_s5 + $0x10] sm:$0xff] }
  0x19   :  { %107 = vmatpush.msra.mxu1 %v84_v21  ;;  %141 = vmatpush.msra.mxu2 %v132_v35  ;;  %v123_v45 = vld [vmem:[%s584_s5 + $0x20] sm:$0xff]  ;;  %v120_v51 = vld [vmem:[%s584_s5 + $0x8] sm:$0xff]  ;;  %v175_v53 = vld [vmem:[%s586_s7 + $0x78] sm:$0xff] }
  0x1a   :  { %69 = vmatpush.msra.mxu0 %v40_v22  ;;  %v119_v52 = vld [vmem:[%s584_s5] sm:$0xff]  ;;  %v174_v54 = vld [vmem:[%s586_s7 + $0x70] sm:$0xff]  ;;  %180 = vmatpush.msra.mxu3 %v175_v53  ;;  %v173_v55 = vld [vmem:[%s586_s7 + $0x68] sm:$0xff] }
  0x1b   :  { %108 = vmatpush.msra.mxu1 %v83_v23  ;;  %142 = vmatpush.msra.mxu2 %v131_v36  ;;  %v172_v56 = vld [vmem:[%s586_s7 + $0x60] sm:$0xff]  ;;  %v171_v57 = vld [vmem:[%s586_s7 + $0x58] sm:$0xff]  ;;  %v170_v58 = vld [vmem:[%s586_s7 + $0x50] sm:$0xff] }
  0x1c   :  { %70 = vmatpush.msra.mxu0 %v39_v24  ;;  %181 = vmatpush.msra.mxu3 %v174_v54  ;;  %v169_v59 = vld [vmem:[%s586_s7 + $0x48] sm:$0xff]  ;;  %v168_v60 = vld [vmem:[%s586_s7 + $0x40] sm:$0xff]  ;;  %v167_v61 = vld [vmem:[%s586_s7 + $0x38] sm:$0xff] }
  0x1d   :  { %109 = vmatpush.msra.mxu1 %v82_v28  ;;  %143 = vmatpush.msra.mxu2 %v130_v37  ;;  %v166_v62 = vld [vmem:[%s586_s7 + $0x30] sm:$0xff]  ;;  %v165_v63 = vld [vmem:[%s586_s7 + $0x28] sm:$0xff]  ;;  %v164_v0 = vld [vmem:[%s586_s7 + $0x20] sm:$0xff] }
  0x1e   :  { %71 = vmatpush.msra.mxu0 %v38_v25  ;;  %182 = vmatpush.msra.mxu3 %v173_v55  ;;  %v163_v1 = vld [vmem:[%s586_s7 + $0x18] sm:$0xff]  ;;  %v248_v2 = vld [vmem:[%s583_s4] ss:$0 sm:$0xff]  ;;  %v162_v6 = vld [vmem:[%s586_s7 + $0x10] sm:$0xff] }
  0x1f   :  { %110 = vmatpush.msra.mxu1 %v81_v29  ;;  %144 = vmatpush.msra.mxu2 %v129_v38  ;;  %v161_v7 = vld [vmem:[%s586_s7 + $0x8] sm:$0xff]  ;;  %v160_v8 = vld [vmem:[%s586_s7] sm:$0xff] }
  0x20   :  { %72 = vmatpush.msra.mxu0 %v37_v26  ;;  %183 = vmatpush.msra.mxu3 %v172_v56  ;;  %v249_v9 = vld [vmem:[%s585_s6] ss:$0 sm:$0xff]  ;;  %s306_s6 = smov [#allocation4]  }
  0x21   :  { %73 = vmatmul.f32.vlgmr.msra.gmra.mxu0 %v446_v27  ;;  %111 = vmatpush.msra.mxu1 %v80_v30  ;;  %v250_v13 = vld [vmem:[%s587_s8] ss:$0 sm:$0xff]  ;;  %s229_s8 = sshll.u32 %s306_s6, 4  ;;  %s230_s8 = int_to_ptr.vmem [resolvable:$true] %s229_s8 }
  0x22   :  { %145 = vmatpush.msra.mxu2 %v128_v39  ;;  %184 = vmatpush.msra.mxu3 %v171_v57 }
  0x23   :  { %112 = vmatpush.msra.mxu1 %v79_v31 }
  0x24   :  { %146 = vmatpush.msra.mxu2 %v127_v40  ;;  %185 = vmatpush.msra.mxu3 %v170_v58 }
  0x25   :  { %113 = vmatpush.msra.mxu1 %v78_v32 }
  0x26   :  { %147 = vmatpush.msra.mxu2 %v126_v41  ;;  %186 = vmatpush.msra.mxu3 %v169_v59 }
  0x28   :  { %148 = vmatpush.msra.mxu2 %v125_v42  ;;  %187 = vmatpush.msra.mxu3 %v168_v60 }
  0x2a   :  { %149 = vmatpush.msra.mxu2 %v124_v43  ;;  %188 = vmatpush.msra.mxu3 %v167_v61 }
  0x2c   :  { %150 = vmatpush.msra.mxu2 %v123_v45  ;;  %189 = vmatpush.msra.mxu3 %v166_v62 }
  0x2e   :  { %151 = vmatpush.msra.mxu2 %v122_v47  ;;  %190 = vmatpush.msra.mxu3 %v165_v63 }
  0x30   :  { %152 = vmatpush.msra.mxu2 %v121_v50  ;;  %191 = vmatpush.msra.mxu3 %v164_v0 }
  0x32   :  { %153 = vmatpush.msra.mxu2 %v120_v51  ;;  %192 = vmatpush.msra.mxu3 %v163_v1 }
  0x34   :  { %154 = vmatpush.msra.mxu2 %v119_v52  ;;  %193 = vmatpush.msra.mxu3 %v162_v6 }
  0x36   :  { %194 = vmatpush.msra.mxu3 %v161_v7 }
  0x38   :  { %195 = vmatpush.msra.mxu3 %v160_v8 }
  0x9e   :  { %v74_v46 = vpop.f32.mrf.mxu0 }
  0x9f   :  { %v75_v48 = vadd.f32 %v247_v44, %v74_v46 }
  0xa1   :  { %251 = vtanh.f32 %v75_v48 }
  0xa7   :  { %v252_v49 = vpop.eup %251 }
  0xa8   :  { %114 = vmatmul.f32.vlgmr.msra.gmra.mxu1 %v252_v49 }
 0x125   :  { %v115_v3 = vpop.f32.mrf.mxu1 }
 0x126   :  { %v116_v4 = vadd.f32 %v248_v2, %v115_v3 }
 0x128   :  { %v118_v5 = vmax.f32 %v116_v4, 0.0 }
 0x12a   :  { %200 = vst [vmem:[#allocation2] sm:$0xff] %v118_v5  ;;  %155 = vmatmul.f32.vlgmr.msra.gmra.mxu2 %v118_v5 }
 0x12b   :  { %223 = dma.vmem_to_hbm [thread:$0]  %s219_s18, 128, %s221_s16, [#allocation3]  }
 0x1ad   :  { %v156_v10 = vpop.f32.mrf.mxu2 }
 0x1ae   :  { %v157_v11 = vadd.f32 %v249_v9, %v156_v10 }
 0x1b0   :  { %v159_v12 = vmax.f32 %v157_v11, 0.0 }
 0x1b2   :  { %196 = vmatmul.f32.vlgmr.msra.gmra.mxu3 %v159_v12 }
 0x235   :  { %v197_v14 = vpop.f32.mrf.mxu3 }
 0x236   :  { %v198_v15 = vadd.f32 %v250_v13, %v197_v14 }
 0x238   :  { %v201_v16 = vsub.f32 %v198_v15, %v446_v27 }
 0x23a   :  { %v202_v17 = vmul.f32 %v201_v16, %v201_v16 }
 0x23c   :  { %203 = vadd.xlane.f32.xlu0 %v202_v17 }
 0x2af   :  { %v204_v18 = vpop.xlane.xlu0 %203 }
 0x2b0   :  { %v205_v19 = vrot.slane %v204_v18, 4 }
 0x2b2   :  { %v206_v20 = vadd.f32 %v205_v19, %v204_v18 }
 0x2b4   :  { %v207_v21 = vrot.slane %v206_v20, 2 }
 0x2b6   :  { %v208_v22 = vadd.f32 %v207_v21, %v206_v20 }
 0x2b8   :  { %v209_v23 = vrot.slane %v208_v22, 1 }
 0x2ba   :  { %v210_v24 = vadd.f32 %v209_v23, %v208_v22 }
 0x2bc   :  { %212 = vst.msk [vmem:[#allocation4] sm:$0x1] %vm211_vm0, %v210_v24 }
 0x2bd   :  { %234 = dma.vmem_to_hbm [thread:$0]  %s230_s8, 16, %s232_s21, [#allocation5]  }
 0x2be   :  { %301 = dma.done.wait [#allocation3], 128  }
 0x2bf   :  { %302 = vsyncadd [#allocation3], 4294967168 }
 0x2c0   :  { %303 = dma.done.wait [#allocation5], 16  }
 0x2c1   :  { %304 = vsyncadd [#allocation5], 4294967280 }
 0x2c2   :  { %243 = vsyncpa [#allocation3], 1 }
 0x2c3   :  { %244 = vsyncpa [#allocation5], 1 }

</bundles_post_ra>
